<compile_context>
chip_gen: v6e
topology: v6e:2x2x1
jax: 0.10.0
libtpu: 0.0.40
codegen_flags: <defaults>
</compile_context>

<pallas_src>
import jax
import jax.numpy as jnp
from jax.experimental import pallas as pl
from jax.experimental.pallas import tpu as pltpu


def grn_kernel(x_ref, gamma_ref, beta_ref, o_ref):
    # x_ref / o_ref: (tn, tc, L); gamma_ref / beta_ref: (1, tc, 1)
    x = x_ref[...]
    gamma = gamma_ref[...].astype(jnp.float32)
    beta = beta_ref[...].astype(jnp.float32)

    # L2 norm along the last (lane) axis with f32 accumulation.
    if x.dtype == jnp.bfloat16:
        # Square in native (packed) bf16; widen only inside the reduction.
        gx2 = jnp.sum(x * x, axis=-1, keepdims=True, dtype=jnp.float32)
    else:
        x32 = x.astype(jnp.float32)
        gx2 = jnp.sum(x32 * x32, axis=-1, keepdims=True)
    gx = jnp.sqrt(gx2)                                    # (tn, tc, 1)

    # Gx.mean(dim=-1) is over a size-1 axis -> identity, so Nx = Gx/(Gx+1e-6).
    # Exact divide on only tn*tc values: effectively free, full accuracy.
    nx = gx / (gx + 1e-6)                                 # (tn, tc, 1)

    # Fused per-channel affine: gamma*(x*Nx) + beta + x == x*(gamma*Nx+1) + beta
    scale = gamma * nx + 1.0                              # (tn, tc, 1)

    if o_ref.dtype == jnp.bfloat16:
        # Keep the bulk elementwise math in packed bf16 (native on v6e/v7x).
        o_ref[...] = x * scale.astype(x.dtype) + beta.astype(x.dtype)
    else:
        o_ref[...] = (x.astype(jnp.float32) * scale + beta).astype(o_ref.dtype)


def _vmem_capacity_bytes():
    """Physical VMEM of the current generation (fallback: 128 MiB)."""
    try:
        return int(pltpu.get_tpu_info().vmem_capacity_bytes)
    except Exception:  # query unavailable (e.g. older runtime) -> conservative
        return 128 << 20


def _working_set_bytes(tn, tc, L, x_isz, p_isz):
    """Double-buffered VMEM bytes for one (tn, tc, L) step."""
    x_blk = tn * tc * L * x_isz          # x block
    o_blk = x_blk                        # out block
    prm = 2 * tc * 128 * p_isz           # gamma + beta, lane-padded (tc,1) tiles
    return 2 * (x_blk + o_blk + prm)     # x2 for double buffering


def _choose_tiles(N, C, L, x_isz, p_isz, target_bytes):
    """Pick (tn, tc): largest block whose double-buffered set ~= target."""
    if _working_set_bytes(N, C, L, x_isz, p_isz) <= target_bytes:
        return N, C                       # whole problem in one block
    # Shrink the batch tile first (keeps channel rows / param tiles whole).
    per_n = _working_set_bytes(1, C, L, x_isz, p_isz)
    tn = min(N, max(1, target_bytes // per_n))
    if _working_set_bytes(tn, C, L, x_isz, p_isz) <= target_bytes:
        return tn, C
    # Still too big at tn = 1: shrink the channel tile (8-aligned sublanes).
    per_row = _working_set_bytes(1, 1, L, x_isz, p_isz)
    tc = max(1, target_bytes // per_row)
    if tc < C:
        tc = min(C, max(8, (tc // 8) * 8))
    else:
        tc = C
    return 1, tc


def grn_pallas(x, gamma, beta, *, n_tile=None, c_tile=None):
    """x: (N, C, L); gamma, beta: (1, C, 1)."""
    N, C, L = x.shape
    assert gamma.shape == (1, C, 1) and beta.shape == (1, C, 1)

    # Lane-dense stores: pad L up to a multiple of 128 (zeros do not change
    # the L2 norm; padded columns are sliced off after the kernel).
    L_pad = max(128, ((L + 127) // 128) * 128)
    x_in = x if L_pad == L else jnp.pad(x, ((0, 0), (0, 0), (0, L_pad - L)))

    x_isz = jnp.dtype(x.dtype).itemsize
    p_isz = jnp.dtype(gamma.dtype).itemsize

    vmem_cap = _vmem_capacity_bytes()
    # Per-buffer-set target: ~8 MiB on 64 MiB-VMEM parts (v7x), ~16 MiB on
    # 128 MiB parts (v5e/v6e). Large enough to sit past the HBM-roofline knee,
    # small enough that big problems still get several overlapped steps.
    target = (8 << 20) if vmem_cap <= (64 << 20) else (16 << 20)

    tn, tc = _choose_tiles(N, C, L_pad, x_isz, p_isz, target)
    if n_tile is not None:
        tn = min(n_tile, N)
    if c_tile is not None:
        tc = min(c_tile, C)

    # N innermost: gamma/beta block index (depends only on c) is constant
    # across consecutive steps, so their DMAs are issued once per channel tile.
    grid = (pl.cdiv(C, tc), pl.cdiv(N, tn))

    ws = _working_set_bytes(tn, tc, L_pad, x_isz, p_isz)
    vmem_bytes = int(ws * 1.25) + (2 << 20)
    vmem_bytes = min(max(vmem_bytes, 8 << 20), (vmem_cap * 3) // 4)

    out = pl.pallas_call(
        grn_kernel,
        out_shape=jax.ShapeDtypeStruct((N, C, L_pad), x.dtype),
        grid_spec=pltpu.PrefetchScalarGridSpec(
            num_scalar_prefetch=0,
            grid=grid,
            in_specs=[
                pl.BlockSpec((tn, tc, L_pad), lambda c, n: (n, c, 0)),
                pl.BlockSpec((1, tc, 1), lambda c, n: (0, c, 0)),
                pl.BlockSpec((1, tc, 1), lambda c, n: (0, c, 0)),
            ],
            out_specs=pl.BlockSpec((tn, tc, L_pad), lambda c, n: (n, c, 0)),
        ),
        compiler_params=pltpu.CompilerParams(
            dimension_semantics=("parallel", "parallel"),
            vmem_limit_bytes=vmem_bytes,
        ),
    )(x_in, gamma, beta)

    if L_pad != L:
        out = out[:, :, :L]
    return out


def grn_reference(x, gamma, beta):
    x32 = x.astype(jnp.float32)
    gx = jnp.sqrt(jnp.sum(x32 * x32, axis=2, keepdims=True))
    nx = gx / (jnp.mean(gx, axis=-1, keepdims=True) + 1e-6)
    return (gamma.astype(jnp.float32) * (x32 * nx)
            + beta.astype(jnp.float32) + x32).astype(x.dtype)


if __name__ == "__main__":
    key = jax.random.PRNGKey(0)
    kx, kg, kb = jax.random.split(key, 3)

    # Small but lane/sublane-aligned shapes: C multiple of 8, L multiple of 128.
    N, C, L = 2, 8, 128
    x = jax.random.normal(kx, (N, C, L), dtype=jnp.float32)

    # Module __init__ uses zeros; use deterministic nonzero values here so the
    # gamma/beta terms of the kernel are actually exercised.
    gamma = 0.1 * jax.random.normal(kg, (1, C, 1), dtype=jnp.float32)
    beta = 0.1 * jax.random.normal(kb, (1, C, 1), dtype=jnp.float32)

    out = jax.block_until_ready(grn_pallas(x, gamma, beta))
    ref = grn_reference(x, gamma, beta)

    assert out.shape == (N, C, L)
    assert jnp.allclose(out, ref, atol=1e-5, rtol=1e-5), (
        f"max err {jnp.max(jnp.abs(out - ref))}")

    print("KERNEL_OK")
</pallas_src>

<mosaic_0001>
module attributes {stable_mosaic.version = 11 : i64} {
  func.func @grn_kernel(%arg0: i32, %arg1: i32, %arg2: memref<2x8x128xf32, #tpu.memory_space<vmem>>, %arg3: memref<1x8x1xf32, #tpu.memory_space<vmem>>, %arg4: memref<1x8x1xf32, #tpu.memory_space<vmem>>, %arg5: memref<2x8x128xf32, #tpu.memory_space<vmem>>) attributes {dimension_semantics = [#tpu.dimension_semantics<parallel>, #tpu.dimension_semantics<parallel>], iteration_bounds = array<i64: 1, 1>, scalar_prefetch = 0 : i64, scratch_operands = 0 : i64, tpu.core_type = #tpu.core_type<tc>, window_params = [{transform_indices = @transform_0, window_bounds = array<i64: 2, 8, 128>}, {transform_indices = @transform_1, window_bounds = array<i64: 1, 8, 1>}, {transform_indices = @transform_2, window_bounds = array<i64: 1, 8, 1>}, {transform_indices = @transform_3, window_bounds = array<i64: 2, 8, 128>}]} {
    %c0 = arith.constant 0 : index
    %c0_0 = arith.constant 0 : index
    %c0_1 = arith.constant 0 : index
    %0 = vector.load %arg2[%c0, %c0_0, %c0_1] : memref<2x8x128xf32, #tpu.memory_space<vmem>>, vector<2x8x128xf32>
    %c0_2 = arith.constant 0 : index
    %c0_3 = arith.constant 0 : index
    %c0_4 = arith.constant 0 : index
    %1 = vector.load %arg3[%c0_2, %c0_3, %c0_4] : memref<1x8x1xf32, #tpu.memory_space<vmem>>, vector<1x8x1xf32>
    %c0_5 = arith.constant 0 : index
    %c0_6 = arith.constant 0 : index
    %c0_7 = arith.constant 0 : index
    %2 = vector.load %arg4[%c0_5, %c0_6, %c0_7] : memref<1x8x1xf32, #tpu.memory_space<vmem>>, vector<1x8x1xf32>
    %3 = arith.mulf %0, %0 : vector<2x8x128xf32>
    %cst = arith.constant dense<0.000000e+00> : vector<2x8xf32>
    %4 = vector.multi_reduction <add>, %3, %cst [2] : vector<2x8x128xf32> to vector<2x8xf32>
    %5 = vector.shape_cast %4 : vector<2x8xf32> to vector<2x8x1xf32>
    %6 = math.sqrt %5 : vector<2x8x1xf32>
    %cst_8 = arith.constant 9.99999997E-7 : f32
    %7 = vector.broadcast %cst_8 : f32 to vector<2x8x1xf32>
    %8 = arith.addf %6, %7 : vector<2x8x1xf32>
    %9 = arith.divf %6, %8 : vector<2x8x1xf32>
    %10 = vector.broadcast %1 : vector<1x8x1xf32> to vector<2x8x1xf32>
    %11 = arith.mulf %10, %9 : vector<2x8x1xf32>
    %cst_9 = arith.constant 1.000000e+00 : f32
    %12 = vector.broadcast %cst_9 : f32 to vector<2x8x1xf32>
    %13 = arith.addf %11, %12 : vector<2x8x1xf32>
    %14 = vector.broadcast %13 : vector<2x8x1xf32> to vector<2x8x128xf32>
    %15 = arith.mulf %0, %14 : vector<2x8x128xf32>
    %16 = vector.broadcast %2 : vector<1x8x1xf32> to vector<2x8x128xf32>
    %17 = arith.addf %15, %16 : vector<2x8x128xf32>
    %c0_10 = arith.constant 0 : index
    %c0_11 = arith.constant 0 : index
    %c0_12 = arith.constant 0 : index
    %18 = vector.load %arg5[%c0_10, %c0_11, %c0_12] : memref<2x8x128xf32, #tpu.memory_space<vmem>>, vector<2x8x128xf32>
    tpu.vector_store %arg5[%c0_10, %c0_11, %c0_12], %17 {strides = array<i32>} : memref<2x8x128xf32, #tpu.memory_space<vmem>>, vector<2x8x128xf32>,
    return
  }
  func.func @transform_0(%arg0: i32, %arg1: i32) -> (i32, i32, i32) {
    %c0_i32 = arith.constant 0 : i32
    %c0_i32_0 = arith.constant 0 : i32
    return %arg1, %arg0, %c0_i32 : i32, i32, i32
  }
  func.func @transform_1(%arg0: i32, %arg1: i32) -> (i32, i32, i32) {
    %c0_i32 = arith.constant 0 : i32
    %c0_i32_0 = arith.constant 0 : i32
    %c0_i32_1 = arith.constant 0 : i32
    return %c0_i32, %arg0, %c0_i32_0 : i32, i32, i32
  }
  func.func @transform_2(%arg0: i32, %arg1: i32) -> (i32, i32, i32) {
    %c0_i32 = arith.constant 0 : i32
    %c0_i32_0 = arith.constant 0 : i32
    %c0_i32_1 = arith.constant 0 : i32
    return %c0_i32, %arg0, %c0_i32_0 : i32, i32, i32
  }
  func.func @transform_3(%arg0: i32, %arg1: i32) -> (i32, i32, i32) {
    %c0_i32 = arith.constant 0 : i32
    %c0_i32_0 = arith.constant 0 : i32
    return %arg1, %arg0, %c0_i32 : i32, i32, i32
  }
}

</mosaic_0001>

<bundles_post_ra>
// kernel: tpu_custom_call.1
= control target key start
LH: loop header
LB: loop body
LE: loop exit
PB: predicated region body
PF: predicated region fallthrough
CT: control target
= control target key end

     0   :  { %s161_s0 = inlined_call_operand.vmem [shape: f32[2,8,128], index: 0, kind: input, shape index: {}]   ;;  %s162_s1 = inlined_call_operand.vmem [shape: f32[1,8,1], index: 1, kind: input, shape index: {}]   ;;  %s163_s2 = inlined_call_operand.vmem [shape: f32[1,8,1], index: 2, kind: input, shape index: {}]   ;;  %s164_s3 = inlined_call_operand.hbm [shape: f32[2,8,128], index: 3, kind: output, shape index: {}]  }
   0x1   :  { %v15_v0 = vld [vmem:[%s161_s0] sm:$0xff]  ;;  %v16_v1 = vld [vmem:[%s161_s0 + $0x8] sm:$0xff] }
   0x2   :  { %8 = vsyncpa [#allocation3], 0  ;;  %v19_v2 = vmul.f32 %v15_v0, %v15_v0  ;;  %v20_v3 = vmul.f32 %v16_v1, %v16_v1  ;;  %v122_v4 = vmov 0   ;;  %v18_v5 = vld [vmem:[%s163_s2] sm:$0xff]  ;;  %s123_s18 = smov [#allocation2]  }
   0x3   :  { %90 = vset.pattern.permute.xlu1 %v122_v4  ;;  %91 = vset.pattern.permute.xlu0 %v122_v4  ;;  %v17_v21 = vld [vmem:[%s162_s1] sm:$0xff]  ;;  %s75_s19 = sshll.u32 %s123_s18, 4  ;;  %s76_s19 = int_to_ptr.vmem [resolvable:$true] %s75_s19 }
   0x4   :  { %21 = vadd.xlane.f32.xlu0 %v19_v2  ;;  %s100_s1 = scalar_lea.vmem %s76_s19, 256  ;;  %p105_p1 = scmp.lt.s32.totalorder %s76_s19, %s76_s19 }
   0x5   :  { %p101_p0 = scmp.ne.s32.totalorder %s76_s19, %s100_s1  ;;  %p106_p2 = scmp.lt.s32.totalorder %s100_s1, %s100_s1 }
   0x7   :  { %p107_p3 = por %p106_p2, %p105_p1 }
   0x8   :  { %23 = vadd.xlane.f32.xlu0 %v20_v3 }
   0x9   :  { %p108_p4 = pnand %p107_p3, %p101_p0 }
  0x1e   :  { %63 = vperm.xlu0 %91, %v18_v5  }
  0x8d   :  { %v22_v6 = vpop.xlane.xlu0 %21 }
  0x8e   :  { %92 = vrsqrt.f32 %v22_v6  ;;  %vm27_vm0 = vcmp.eq.f32.partialorder %v22_v6, inf  ;;  %v30_v10 = vand.u32 2147483648, %v22_v6  ;;  %vm29_vm1 = vcmp.eq.f32.partialorder %v22_v6, 0.0 }
  0x91   :  { %v24_v7 = vpop.xlane.xlu0 %23 }
  0x92   :  { %94 = vrsqrt.f32 %v24_v7  ;;  %vm34_vm2 = vcmp.eq.f32.partialorder %v24_v7, inf  ;;  %v37_v16 = vand.u32 2147483648, %v24_v7  ;;  %vm36_vm3 = vcmp.eq.f32.partialorder %v24_v7, 0.0 }
  0x99   :  { %v64_v30 = vpop.permute.xlu0 %63 }
  0x9b   :  { %v93_v8 = vpop.eup %92 }
  0x9c   :  { %v26_v9 = vmul.f32 %v93_v8, %v22_v6 }
  0x9e   :  { %v28_v11 = vsel %vm27_vm0, %v22_v6, %v26_v9 }
  0x9f   :  { %v95_v12 = vpop.eup %94  ;;  %v31_v13 = vsel %vm29_vm1, %v30_v10, %v28_v11 }
  0xa0   :  { %v33_v14 = vmul.f32 %v95_v12, %v24_v7  ;;  %v39_v15 = vadd.f32 1e-06, %v31_v13 }
  0xa2   :  { %96 = vrcp.f32 %v39_v15  ;;  %v35_v17 = vsel %vm34_vm2, %v24_v7, %v33_v14 }
  0xa3   :  { %v38_v18 = vsel %vm36_vm3, %v37_v16, %v35_v17 }
  0xa4   :  { %v40_v19 = vadd.f32 1e-06, %v38_v18 }
  0xa6   :  { %98 = vrcp.f32 %v40_v19 }
  0xaf   :  { %v97_v20 = vpop.eup %96 }
  0xb0   :  { %v42_v22 = vmul.f32 %v97_v20, %v31_v13 }
  0xb2   :  { %v45_v23 = vmul.f32 %v42_v22, %v17_v21 }
  0xb3   :  { %v99_v24 = vpop.eup %98 }
  0xb4   :  { %v47_v25 = vadd.f32 1.0, %v45_v23  ;;  %v44_v26 = vmul.f32 %v99_v24, %v38_v18 }
  0xb6   :  { %51 = vperm.xlu1 %90, %v47_v25   ;;  %v46_v27 = vmul.f32 %v44_v26, %v17_v21 }
  0xb8   :  { %v48_v28 = vadd.f32 1.0, %v46_v27 }
  0xba   :  { %56 = vperm.xlu1 %90, %v48_v28  }
 0x131   :  { %v52_v29 = vpop.permute.xlu1 %51 }
 0x132   :  { %v59_v31 = vmul.f32 %v52_v29, %v15_v0 }
 0x134   :  { %v66_v32 = vadd.f32 %v64_v30, %v59_v31 }
 0x135   :  { %v57_v33 = vpop.permute.xlu1 %56 }
 0x136   :  { %68 = vst [vmem:[#allocation2] sm:$0xff] %v66_v32  ;;  %v60_v34 = vmul.f32 %v57_v33, %v16_v1 }
 0x138   :  { %v67_v35 = vadd.f32 %v64_v30, %v60_v34 }
 0x13a   :  { %69 = vst [vmem:[#allocation2 + $0x8] sm:$0xff] %v67_v35 }
 0x13b   :  { %111 = shalt.err (!%p108_p4)
}
 0x13c   :  { %s124_s20 = smov 128   ;;  %s125_s21 = smov 8  }
 0x13d   :  { %81 = dma.vmem_to_hbm [thread:$0]  %s76_s19, 256, %s164_s3, [#allocation3], %s124_s20, %s124_s20, %s125_s21  }
 0x13e   :  { %120 = dma.done.wait [#allocation3], 256  }
 0x13f   :  { %121 = vsyncadd [#allocation3], 4294967040 }
 0x140   :  { %85 = vsyncpa [#allocation3], 1 }

</bundles_post_ra>
